<compile_context>
chip_gen: v6e
topology: v6e:2x2x1
jax: 0.10.0
libtpu: 0.0.40
codegen_flags: <defaults>
</compile_context>

<pallas_src>
import functools

import jax
import jax.numpy as jnp
from jax.experimental import pallas as pl
from jax.experimental.pallas import tpu as pltpu

_LANE = 128  # lane width of a TPU vreg


def _round_up(x: int, m: int) -> int:
    return ((x + m - 1) // m) * m


def _sublane_multiple(dtype) -> int:
    # Full-vreg packing: f32 -> 8 sublanes, bf16 -> 16, int8/fp8 -> 32.
    itemsize = jnp.dtype(dtype).itemsize
    return 8 * max(1, 4 // itemsize)


def _perturb_kernel(x_ref, d_ref, o_ref):
    # x_ref : (block_rows, 128) tile of one image (leading batch dim squeezed)
    # d_ref : (block_rows, 128) matching tile of cached delta (batch-broadcast)
    # o_ref : (block_rows, 128)
    xv = x_ref[...].astype(jnp.float32)
    dv = d_ref[...].astype(jnp.float32)
    o_ref[...] = jnp.clip(xv + dv, 0.0, 1.0).astype(o_ref.dtype)


def prepare_delta(w_matrix, epsilon):
    """One-time (off the hot path): delta = eps*tanh(w) in lane-dense layout.

    Returns (delta_main, delta_tail):
      delta_main: (rows, 128) with rows = d // 128 (or None if d < 128)
      delta_tail: (d % 128,)  (or None if d is 128-aligned)
    """
    _, c, h, w = w_matrix.shape
    d = c * h * w
    rows = d // _LANE
    tail = d - rows * _LANE
    delta = (float(epsilon) * jnp.tanh(w_matrix.astype(jnp.float32))).astype(
        w_matrix.dtype)
    delta_flat = delta.reshape(d)
    delta_main = delta_flat[: rows * _LANE].reshape(rows, _LANE) if rows else None
    delta_tail = delta_flat[rows * _LANE:] if tail else None
    return delta_main, delta_tail


@functools.partial(jax.jit, static_argnames=("max_block_rows",))
def perturb_apply(x, delta_main, delta_tail, *, max_block_rows=4096):
    """clip(x + delta, 0, 1) with delta pre-computed by prepare_delta."""
    n, c, h, w = x.shape
    d = c * h * w
    dtype = x.dtype
    x_itemsize = jnp.dtype(dtype).itemsize
    x2 = x.reshape(n, d)

    rows = 0 if delta_main is None else delta_main.shape[0]
    out_parts = []

    if rows > 0:
        d_main = rows * _LANE
        if d_main == d:
            # Fully aligned: free bitcast, zero wrapper copies.
            x_main = x2.reshape(n, rows, _LANE)
        else:
            # 128-aligned prefix; the <128-element tail is handled below.
            x_main = x2[:, :d_main].reshape(n, rows, _LANE)

        sub = _sublane_multiple(dtype)
        if rows <= max_block_rows:
            block_rows = rows              # full-extent block: no %8 requirement
            num_row_blocks = 1
        else:
            block_rows = _round_up(pl.cdiv(rows, pl.cdiv(rows, max_block_rows)), sub)
            num_row_blocks = pl.cdiv(rows, block_rows)

        d_itemsize = jnp.dtype(delta_main.dtype).itemsize
        blk = block_rows * _LANE
        # Double-buffered footprint: x in + out (x dtype) + delta, plus margin.
        vmem_limit = int(2 * blk * (2 * x_itemsize + d_itemsize) + (2 << 20))

        cost = pl.CostEstimate(
            flops=3 * n * rows * _LANE,          # add + 2x clamp per element
            transcendentals=0,                   # tanh hoisted into prepare_delta
            bytes_accessed=2 * n * rows * _LANE * x_itemsize
            + rows * _LANE * d_itemsize,
        )

        out3 = pl.pallas_call(
            _perturb_kernel,
            out_shape=jax.ShapeDtypeStruct((n, rows, _LANE), dtype),
            # Batch is the inner grid axis; delta's block index ignores it, so
            # the broadcast delta block is reused (no re-DMA) across batch steps.
            grid=(num_row_blocks, n),
            in_specs=[
                pl.BlockSpec((None, block_rows, _LANE), lambda j, b: (b, j, 0)),  # x
                pl.BlockSpec((block_rows, _LANE), lambda j, b: (j, 0)),           # delta
            ],
            out_specs=pl.BlockSpec((None, block_rows, _LANE), lambda j, b: (b, j, 0)),
            compiler_params=pltpu.CompilerParams(
                dimension_semantics=("parallel", "parallel"),
                vmem_limit_bytes=vmem_limit,
            ),
            cost_estimate=cost,
        )(x_main, delta_main)
        out_parts.append(out3.reshape(n, rows * _LANE))

    if delta_tail is not None:
        # Tiny (<128 element) tail: plain jnp, negligible traffic.
        x_tail = x2[:, rows * _LANE:]
        out_tail = jnp.clip(
            x_tail.astype(jnp.float32) + delta_tail.astype(jnp.float32)[None, :],
            0.0, 1.0).astype(dtype)
        out_parts.append(out_tail)

    out2 = out_parts[0] if len(out_parts) == 1 else jnp.concatenate(out_parts, axis=1)
    return out2.reshape(n, c, h, w)


# --- stand-ins for the opaque defense modules --------------------------------
# TODO(synk): defense_augmentation / defense_ensemble are arbitrary external
# nn.Modules passed to __init__; no defined computation to translate, so they
# are identity callables here.
def defense_augmentation(x):
    return x


def defense_ensemble(x):
    return x


class PerturbationNet:
    """JAX/Pallas port of the PyTorch PerturbationNet."""

    def __init__(self, defense_ensemble_fn, defense_augmentation_fn, epsilon):
        self.defense_ensemble = defense_ensemble_fn
        self.defense_augmentation = defense_augmentation_fn
        self.epsilon = float(epsilon)
        self.w_matrix = None
        self._delta_main = None
        self._delta_tail = None

    def set_w_matrix(self, w_matrix):
        # Hoist eps*tanh(w) + layout prep out of the per-call hot path.
        # TODO(synk): if w_matrix is being optimized, call set_w_matrix after
        # every update (gradients through tanh flow outside this kernel).
        self.w_matrix = w_matrix
        self._delta_main, self._delta_tail = prepare_delta(w_matrix, self.epsilon)

    def __call__(self, x):
        assert self.w_matrix is not None, "call set_w_matrix() first"
        perturbed_clamped = perturb_apply(x, self._delta_main, self._delta_tail)
        augmented = self.defense_augmentation(perturbed_clamped)
        return self.defense_ensemble(augmented)


if __name__ == "__main__":
    epsilon = 0.0625  # ~16/255
    key = jax.random.PRNGKey(0)
    kx, kw, kx2, kw2, kx3, kw3 = jax.random.split(key, 6)

    # 1) Aligned path (d = 3*16*16 = 768 = 6*128): zero wrapper copies.
    N, C, H, W = 2, 3, 16, 16
    x = jax.random.uniform(kx, (N, C, H, W), dtype=jnp.float32)            # images in [0,1]
    w_matrix = 0.5 * jax.random.normal(kw, (1, C, H, W), dtype=jnp.float32)
    net = PerturbationNet(defense_ensemble, defense_augmentation, epsilon)
    net.set_w_matrix(w_matrix)
    out = jax.block_until_ready(net(x))
    ref = jnp.clip(x + epsilon * jnp.tanh(w_matrix), 0.0, 1.0)
    assert out.shape == (N, C, H, W)
    assert jnp.allclose(out, ref, atol=1e-6), "mismatch vs reference (aligned)"

    # 2) Multi-row-block path with delta-block reuse across the batch axis.
    x2 = jax.random.uniform(kx2, (2, 3, 64, 64), dtype=jnp.float32)        # rows = 96
    w2 = 0.5 * jax.random.normal(kw2, (1, 3, 64, 64), dtype=jnp.float32)
    dm2, dt2 = prepare_delta(w2, epsilon)
    out2 = jax.block_until_ready(perturb_apply(x2, dm2, dt2, max_block_rows=32))
    ref2 = jnp.clip(x2 + epsilon * jnp.tanh(w2), 0.0, 1.0)
    assert jnp.allclose(out2, ref2, atol=1e-6), "mismatch vs reference (multi-block)"

    # 3) Unaligned d (like production 3*299*299): kernel on the 128-aligned
    #    prefix, <128-element tail handled in plain jnp.
    x3 = jax.random.uniform(kx3, (2, 3, 19, 19), dtype=jnp.float32)        # d=1083, tail=59
    w3 = 0.5 * jax.random.normal(kw3, (1, 3, 19, 19), dtype=jnp.float32)
    dm3, dt3 = prepare_delta(w3, epsilon)
    out3 = jax.block_until_ready(perturb_apply(x3, dm3, dt3))
    ref3 = jnp.clip(x3 + epsilon * jnp.tanh(w3), 0.0, 1.0)
    assert jnp.allclose(out3, ref3, atol=1e-6), "mismatch vs reference (unaligned tail)"

    print("KERNEL_OK")
</pallas_src>

<mosaic_0001>
module attributes {stable_mosaic.version = 11 : i64} {
  func.func @_perturb_kernel(%arg0: i32, %arg1: i32, %arg2: memref<1x6x128xf32, #tpu.memory_space<vmem>>, %arg3: memref<6x128xf32, #tpu.memory_space<vmem>>, %arg4: memref<1x6x128xf32, #tpu.memory_space<vmem>>) attributes {dimension_semantics = [#tpu.dimension_semantics<parallel>, #tpu.dimension_semantics<parallel>], iteration_bounds = array<i64: 1, 2>, scalar_prefetch = 0 : i64, scratch_operands = 0 : i64, tpu.core_type = #tpu.core_type<tc>, window_params = [{transform_indices = @transform_0, window_bounds = array<i64: 1, 6, 128>}, {transform_indices = @transform_1, window_bounds = array<i64: 6, 128>}, {transform_indices = @transform_2, window_bounds = array<i64: 1, 6, 128>}]} {
    %c0 = arith.constant 0 : index
    %c0_0 = arith.constant 0 : index
    %c0_1 = arith.constant 0 : index
    %0 = vector.load %arg2[%c0, %c0_0, %c0_1] : memref<1x6x128xf32, #tpu.memory_space<vmem>>, vector<1x6x128xf32>
    %1 = vector.shape_cast %0 : vector<1x6x128xf32> to vector<6x128xf32>
    %c0_2 = arith.constant 0 : index
    %c0_3 = arith.constant 0 : index
    %2 = vector.load %arg3[%c0_2, %c0_3] : memref<6x128xf32, #tpu.memory_space<vmem>>, vector<6x128xf32>
    %3 = arith.addf %1, %2 : vector<6x128xf32>
    %cst = arith.constant 0.000000e+00 : f32
    %cst_4 = arith.constant 1.000000e+00 : f32
    %4 = vector.broadcast %cst : f32 to vector<6x128xf32>
    %5 = arith.maximumf %4, %3 : vector<6x128xf32>
    %6 = vector.broadcast %cst_4 : f32 to vector<6x128xf32>
    %7 = arith.minimumf %6, %5 : vector<6x128xf32>
    %c0_5 = arith.constant 0 : index
    %c0_6 = arith.constant 0 : index
    %c0_7 = arith.constant 0 : index
    %8 = vector.load %arg4[%c0_5, %c0_6, %c0_7] : memref<1x6x128xf32, #tpu.memory_space<vmem>>, vector<1x6x128xf32>
    %9 = vector.shape_cast %8 : vector<1x6x128xf32> to vector<6x128xf32>
    %10 = vector.shape_cast %7 : vector<6x128xf32> to vector<1x6x128xf32>
    tpu.vector_store %arg4[%c0_5, %c0_6, %c0_7], %10 {strides = array<i32>} : memref<1x6x128xf32, #tpu.memory_space<vmem>>, vector<1x6x128xf32>,
    return
  }
  func.func @transform_0(%arg0: i32, %arg1: i32) -> (i32, i32, i32) {
    %c0_i32 = arith.constant 0 : i32
    %c0_i32_0 = arith.constant 0 : i32
    return %arg1, %arg0, %c0_i32 : i32, i32, i32
  }
  func.func @transform_1(%arg0: i32, %arg1: i32) -> (i32, i32) {
    %c0_i32 = arith.constant 0 : i32
    %c0_i32_0 = arith.constant 0 : i32
    return %arg0, %c0_i32 : i32, i32
  }
  func.func @transform_2(%arg0: i32, %arg1: i32) -> (i32, i32, i32) {
    %c0_i32 = arith.constant 0 : i32
    %c0_i32_0 = arith.constant 0 : i32
    return %arg1, %arg0, %c0_i32 : i32, i32, i32
  }
}

</mosaic_0001>

<bundles_post_ra>
// kernel: perturb_apply.1
= control target key start
LH: loop header
LB: loop body
LE: loop exit
PB: predicated region body
PF: predicated region fallthrough
CT: control target
= control target key end

     0   :  { %s356_s9 = smov 0   ;;  %s358_s10 = smov 0   ;;  %s380_s0 = inlined_call_operand.vmem [shape: f32[2,6,128], index: 0, kind: input, shape index: {}]   ;;  %s381_s1 = inlined_call_operand.vmem [shape: f32[6,128], index: 1, kind: input, shape index: {}]   ;;  %s382_s2 = inlined_call_operand.vmem [shape: f32[2,6,128], index: 2, kind: output, shape index: {}]  }
   0x1   :  { %s360_s11 = smov 0  }
   0x2 LB: > { %s21_s12 = sadd.s32 1, %s335_s10  ;;  %p288_p0 = scmp.ge.s32.totalorder %s339_s11, 1  ;;  %s339_s11 = sphi %s360_s11, %s12_s11   ;;  %s335_s10 = sphi %s358_s10, %s384_s10   ;;  %s331_s9 = sphi %s356_s9, %s383_s9  }
   0x3   : > { %p22_p1 = scmp.ge.s32.totalorder %s21_s12, 2  ;;  %p139_p2 = scmp.lt.s32.totalorder %s339_s11, 3 }
   0x5   : > { %s386_s12 = smov (%p22_p1, %s21_s12), 0  ;;  %p140_p3 = pnand %p288_p0, %p139_p2 }
   0x6   : > { %p169_p4 = scmp.lt.s32.totalorder (!%p140_p3), %s331_s9, 1 }
   0x7   : > { %143 = sbr.rel (%p140_p3) target bundleno = 23 (0x17), region = 28 }
   0xc   : > { %s388_s9 = smov (!%p169_p4, %s331_s9), 1  ;;  %v188_v0 = vld [vmem:[%s381_s1] sm:$0x3f] }
   0xd   : > { %s289_s13 = sshll.u32 %s388_s9, 3 }
   0xe   : > { %s175_s18 = scalar_lea.vmem %s380_s0, %s289_s13  ;;  %s186_s21 = scalar_lea.vmem %s382_s2, %s289_s13 }
   0xf   : > { %v187_v1 = vld [vmem:[%s175_s18] sm:$0x3f] }
  0x10   : > { %v189_v2 = vadd.f32 %v188_v0, %v187_v1 }
  0x12   : > { %v190_v3 = vmax.f32 %v189_v2, 0.0 }
  0x14   : > { %v191_v4 = vmin.f32 %v190_v3, 1.0 }
  0x16   : > { %192 = vst [vmem:[%s186_s21] sm:$0x3f] %v191_v4 }
  0x17 PF: > { %s12_s11 = sadd.s32 1, %s339_s11   ;;  %s383_s9 = smov %s335_s10 }
  0x18   : > { %p9_p5 = scmp.ge.s32.totalorder %s12_s11, 4   ;;  %s384_s10 = smov %s386_s12 }
  0x1a   :  { %11 = sbr.rel (!%p9_p5) target bundleno = 2 (0x2), region = 61 }

</bundles_post_ra>
